<compile_context>
chip_gen: v6e
topology: v6e:2x2x1
jax: 0.10.0
libtpu: 0.0.40
codegen_flags: <defaults>
</compile_context>

<pallas_src>
import functools

import jax
import jax.numpy as jnp
from jax.experimental import pallas as pl
from jax.experimental.pallas import tpu as pltpu


def _focal_kernel(logits_ref, target_ref, loss_ref, *, alpha, gamma, eps):
    x = logits_ref[...].astype(jnp.float32)                       # (TB, C)
    t = target_ref[...]                                           # (TB, 1) int32

    class_ids = jax.lax.broadcasted_iota(jnp.int32, x.shape, 1)   # (TB, C)
    # Target-class logit, gathered independently of the full-block exp so the
    # per-sample tail can overlap the next block's DMA / exp.
    x_t = jnp.sum(jnp.where(class_ids == t, x, 0.0), axis=1, keepdims=True)

    m = jnp.max(x, axis=1, keepdims=True)                         # (TB, 1)
    sum_e = jnp.sum(jnp.exp(x - m), axis=1, keepdims=True)        # (TB, 1)

    # p_t = softmax(x)[target] + eps  (exact divide; per-sample only).
    p_t = jnp.exp(x_t - m) / sum_e + eps                          # (TB, 1)

    one_minus = 1.0 - p_t
    g = float(gamma)
    if g == 0.0:
        w = jnp.ones_like(p_t)
    elif g.is_integer() and 0.0 < g <= 8.0:
        # Integer gamma (default 2.0): repeated multiply on the VPU (no pow).
        w = one_minus
        for _ in range(int(g) - 1):
            w = w * one_minus
    else:
        # Non-integer gamma: clamp so pow never sees a negative base.
        # NOTE: intentional difference vs. torch, which would produce NaN when
        # softmax + eps exceeds 1 for the dominant class.
        w = jnp.power(jnp.maximum(one_minus, 0.0), g)

    loss_ref[...] = (-alpha) * w * jnp.log(p_t)                   # (TB, 1)


def _round_up(x, m):
    return ((x + m - 1) // m) * m


def _vmem_capacity_bytes():
    try:
        cap = int(pltpu.get_tpu_info().vmem_capacity_bytes)
        if cap > 0:
            return cap
    except Exception:
        pass
    return 64 * 1024 * 1024      # conservative: smallest per-core VMEM (v7x)


def focal_loss(logits, targets, *, alpha, gamma=2.0, reduction="none",
               eps=1e-6, block_b=None):
    """Pallas implementation of FocalLoss.forward.

    logits:  (B, C) float (f32 or bf16; kept in its own dtype in HBM)
    targets: (B,)   int, with 0 <= targets[i] <= C-1
    """
    if logits.ndim != 2:
        raise ValueError(f"Invalid input shape, we expect BxN. Got: {logits.shape}")
    B, C = logits.shape
    in_itemsize = logits.dtype.itemsize

    # --- Batch-tile sizing (VMEM / generation aware). -----------------------
    vmem_cap = _vmem_capacity_bytes()
    vmem_budget = (3 * vmem_cap) // 4          # 48 MiB on v7x, 96 MiB on v5e/v6e

    # Per-row VMEM estimate: double-buffered input block + ~4 f32 full-block
    # temporaries (iota/mask/exp), plus the lane-padded (TB, 1) target and
    # loss columns (each padded to 128 lanes, double-buffered).
    lane_c = max(_round_up(C, 128), 128)
    per_row = lane_c * (2 * in_itemsize + 16) + 4 * 128 * 4
    if block_b is None:
        block_b = (vmem_budget // 2) // per_row
    block_b = max(8, min(int(block_b), 65536))
    block_b = (block_b // 8) * 8               # sublane-aligned

    b_ceil = _round_up(B, 8)
    if b_ceil >= 256:                          # >= 2 blocks so both v7x TCs work
        block_b = min(block_b, _round_up(pl.cdiv(b_ceil, 2), 8))
    block_b = min(block_b, b_ceil)
    num_blocks = pl.cdiv(B, block_b)
    # TODO(synk): for very large C (a single (8, C) row-block no longer fits the
    # VMEM budget) add a class-tiling grid axis with online max/sum-exp
    # accumulators (flash-softmax style).

    vmem_limit = int(min(vmem_budget, vmem_cap - (4 << 20)))

    # Only tiny (B,) plumbing in the wrapper; the (B, C) logits go in as-is.
    targets_col = targets.astype(jnp.int32).reshape(B, 1)

    kernel = functools.partial(_focal_kernel, alpha=float(alpha),
                               gamma=float(gamma), eps=float(eps))

    loss_col = pl.pallas_call(
        kernel,
        out_shape=jax.ShapeDtypeStruct((B, 1), jnp.float32),
        grid_spec=pltpu.PrefetchScalarGridSpec(
            num_scalar_prefetch=0,
            grid=(num_blocks,),
            in_specs=[
                pl.BlockSpec((block_b, C), lambda i: (i, 0)),   # full class dim
                pl.BlockSpec((block_b, 1), lambda i: (i, 0)),
            ],
            out_specs=pl.BlockSpec((block_b, 1), lambda i: (i, 0)),
        ),
        compiler_params=pltpu.CompilerParams(
            dimension_semantics=("parallel",),
            vmem_limit_bytes=vmem_limit,
        ),
    )(logits, targets_col)

    loss_per_sample = loss_col.reshape(B)      # == torch sum(one_hot*focal, dim=1)

    if reduction == "none":
        return loss_per_sample
    elif reduction == "mean":
        return jnp.mean(loss_per_sample)
    elif reduction == "sum":
        return jnp.sum(loss_per_sample)
    else:
        raise NotImplementedError(f"Invalid reduction mode: {reduction}")


def _focal_loss_ref(logits, targets, *, alpha, gamma=2.0, reduction="none",
                    eps=1e-6):
    p = jax.nn.softmax(logits.astype(jnp.float32), axis=1) + eps
    one_hot = jax.nn.one_hot(targets, logits.shape[1], dtype=jnp.float32)
    focal = -alpha * jnp.power(1.0 - p, gamma) * jnp.log(p)
    loss = jnp.sum(one_hot * focal, axis=1)
    if reduction == "none":
        return loss
    if reduction == "mean":
        return jnp.mean(loss)
    return jnp.sum(loss)


if __name__ == "__main__":
    alpha = 0.5
    key = jax.random.PRNGKey(0)

    # Case 1: small batch (single block), default gamma=2.0, all reductions.
    B, C = 16, 32
    k1, k2, key = jax.random.split(key, 3)
    logits = jax.random.normal(k1, (B, C), dtype=jnp.float32)
    targets = jax.random.randint(k2, (B,), 0, C, dtype=jnp.int32)
    for reduction in ("none", "mean", "sum"):
        out = jax.block_until_ready(
            focal_loss(logits, targets, alpha=alpha, gamma=2.0, reduction=reduction))
        ref = _focal_loss_ref(logits, targets, alpha=alpha, gamma=2.0,
                              reduction=reduction)
        assert jnp.allclose(out, ref, atol=2e-5, rtol=2e-4), (
            f"mismatch (reduction={reduction}): {out} vs {ref}")

    # Case 2: multi-block grid + ragged final block + odd class count + non-int gamma.
    B, C = 300, 37
    k1, k2, key = jax.random.split(key, 3)
    logits = jax.random.normal(k1, (B, C), dtype=jnp.float32)
    targets = jax.random.randint(k2, (B,), 0, C, dtype=jnp.int32)
    for gamma in (1.5, 3.0):
        out = jax.block_until_ready(
            focal_loss(logits, targets, alpha=alpha, gamma=gamma,
                       reduction="mean", block_b=128))
        ref = _focal_loss_ref(logits, targets, alpha=alpha, gamma=gamma,
                              reduction="mean")
        assert jnp.allclose(out, ref, atol=2e-5, rtol=2e-4), (
            f"mismatch (gamma={gamma}): {out} vs {ref}")

    # Case 3: bf16 logits stay bf16 in HBM (in-kernel upcast), default tiling
    # (>= 2 blocks for B >= 256), reduction='none'.
    B, C = 272, 64
    k1, k2, key = jax.random.split(key, 3)
    logits = jax.random.normal(k1, (B, C), dtype=jnp.float32).astype(jnp.bfloat16)
    targets = jax.random.randint(k2, (B,), 0, C, dtype=jnp.int32)
    out = jax.block_until_ready(
        focal_loss(logits, targets, alpha=alpha, gamma=2.0, reduction="none"))
    ref = _focal_loss_ref(logits, targets, alpha=alpha, gamma=2.0, reduction="none")
    assert jnp.allclose(out, ref, atol=2e-5, rtol=2e-4), "mismatch (bf16 case)"

    print("KERNEL_OK")
</pallas_src>

<mosaic_0001>
module attributes {stable_mosaic.version = 11 : i64} {
  func.func @_focal_kernel(%arg0: i32, %arg1: memref<16x32xf32, #tpu.memory_space<vmem>>, %arg2: memref<16x1xi32, #tpu.memory_space<vmem>>, %arg3: memref<16x1xf32, #tpu.memory_space<vmem>>) attributes {dimension_semantics = [#tpu.dimension_semantics<parallel>], iteration_bounds = array<i64: 1>, scalar_prefetch = 0 : i64, scratch_operands = 0 : i64, tpu.core_type = #tpu.core_type<tc>, window_params = [{transform_indices = @transform_0, window_bounds = array<i64: 16, 32>}, {transform_indices = @transform_1, window_bounds = array<i64: 16, 1>}, {transform_indices = @transform_2, window_bounds = array<i64: 16, 1>}]} {
    %c0 = arith.constant 0 : index
    %c0_0 = arith.constant 0 : index
    %0 = vector.load %arg1[%c0, %c0_0] : memref<16x32xf32, #tpu.memory_space<vmem>>, vector<16x32xf32>
    %c0_1 = arith.constant 0 : index
    %c0_2 = arith.constant 0 : index
    %1 = vector.load %arg2[%c0_1, %c0_2] : memref<16x1xi32, #tpu.memory_space<vmem>>, vector<16x1xi32>
    %2 = tpu.iota {dimensions = array<i32: 1>} : vector<16x32xi32>
    %3 = vector.broadcast %1 : vector<16x1xi32> to vector<16x32xi32>
    %4 = arith.cmpi eq, %2, %3 : vector<16x32xi32>
    %cst = arith.constant 0.000000e+00 : f32
    %5 = vector.broadcast %cst : f32 to vector<16x32xf32>
    %6 = arith.select %4, %0, %5 : vector<16x32xi1>, vector<16x32xf32>
    %cst_3 = arith.constant dense<0.000000e+00> : vector<16xf32>
    %7 = vector.multi_reduction <add>, %6, %cst_3 [1] : vector<16x32xf32> to vector<16xf32>
    %8 = vector.shape_cast %7 : vector<16xf32> to vector<16x1xf32>
    %cst_4 = arith.constant dense<0xFF800000> : vector<16xf32>
    %9 = vector.multi_reduction <maximumf>, %0, %cst_4 [1] : vector<16x32xf32> to vector<16xf32>
    %10 = vector.shape_cast %9 : vector<16xf32> to vector<16x1xf32>
    %11 = vector.broadcast %10 : vector<16x1xf32> to vector<16x32xf32>
    %12 = arith.subf %0, %11 : vector<16x32xf32>
    %13 = math.exp %12 : vector<16x32xf32>
    %cst_5 = arith.constant dense<0.000000e+00> : vector<16xf32>
    %14 = vector.multi_reduction <add>, %13, %cst_5 [1] : vector<16x32xf32> to vector<16xf32>
    %15 = vector.shape_cast %14 : vector<16xf32> to vector<16x1xf32>
    %16 = arith.subf %8, %10 : vector<16x1xf32>
    %17 = math.exp %16 : vector<16x1xf32>
    %18 = arith.divf %17, %15 : vector<16x1xf32>
    %cst_6 = arith.constant 9.99999997E-7 : f32
    %19 = vector.broadcast %cst_6 : f32 to vector<16x1xf32>
    %20 = arith.addf %18, %19 : vector<16x1xf32>
    %cst_7 = arith.constant 1.000000e+00 : f32
    %21 = vector.broadcast %cst_7 : f32 to vector<16x1xf32>
    %22 = arith.subf %21, %20 : vector<16x1xf32>
    %23 = arith.mulf %22, %22 : vector<16x1xf32>
    %cst_8 = arith.constant -5.000000e-01 : f32
    %24 = vector.broadcast %cst_8 : f32 to vector<16x1xf32>
    %25 = arith.mulf %24, %23 : vector<16x1xf32>
    %26 = math.log %20 : vector<16x1xf32>
    %27 = arith.mulf %25, %26 : vector<16x1xf32>
    %c0_9 = arith.constant 0 : index
    %c0_10 = arith.constant 0 : index
    %28 = vector.load %arg3[%c0_9, %c0_10] : memref<16x1xf32, #tpu.memory_space<vmem>>, vector<16x1xf32>
    tpu.vector_store %arg3[%c0_9, %c0_10], %27 {strides = array<i32>} : memref<16x1xf32, #tpu.memory_space<vmem>>, vector<16x1xf32>,
    return
  }
  func.func @transform_0(%arg0: i32) -> (i32, i32) {
    %c0_i32 = arith.constant 0 : i32
    %c0_i32_0 = arith.constant 0 : i32
    return %arg0, %c0_i32 : i32, i32
  }
  func.func @transform_1(%arg0: i32) -> (i32, i32) {
    %c0_i32 = arith.constant 0 : i32
    %c0_i32_0 = arith.constant 0 : i32
    return %arg0, %c0_i32 : i32, i32
  }
  func.func @transform_2(%arg0: i32) -> (i32, i32) {
    %c0_i32 = arith.constant 0 : i32
    %c0_i32_0 = arith.constant 0 : i32
    return %arg0, %c0_i32 : i32, i32
  }
}

</mosaic_0001>

<bundles_post_ra>
// kernel: tpu_custom_call.1
= control target key start
LH: loop header
LB: loop body
LE: loop exit
PB: predicated region body
PF: predicated region fallthrough
CT: control target
= control target key end

     0   :  { %vm27_vm0 = vcmask 261120   ;;  %v102_v0 = vmov 0   ;;  %v15_v7 = vlaneseq  ;;  %vm76_vm3 = vcmask 7168   ;;  %s142_s1 = inlined_call_operand.vmem [shape: s32[16,1], index: 1, kind: input, shape index: {}]   ;;  %s143_s0 = inlined_call_operand.vmem [shape: f32[16,32], index: 0, kind: input, shape index: {}]   ;;  %s144_s2 = inlined_call_operand.vmem [shape: f32[16,1], index: 2, kind: output, shape index: {}]  }
   0x1   :  { %84 = vset.pattern.permute.xlu1 %v102_v0  ;;  %v13_v1 = vld [vmem:[%s142_s1] sm:$0xff]  ;;  %85 = vset.pattern.permute.xlu0 %v102_v0  ;;  %v12_v4 = vld [vmem:[%s143_s0 + $0x8] sm:$0xff] }
   0x2   :  { %v11_v2 = vld [vmem:[%s143_s0] sm:$0xff]  ;;  %18 = vperm.xlu1 %84, %v13_v1   ;;  %v14_v5 = vld [vmem:[%s142_s1 + $0x8] sm:$0xff]  ;;  %v37_v6 = vsel %vm27_vm0, %v12_v4, -inf  ;;  %v16_v8 = vand.u32 127, %v15_v7 }
   0x3   :  { %v34_v3 = vsel %vm27_vm0, %v11_v2, -inf }
   0x4   :  { %35 = vmax.xlane.f32.xlu0 %v34_v3 }
   0x6   :  { %21 = vperm.xlu1 %84, %v14_v5  }
   0x8   :  { %38 = vmax.xlane.f32.xlu0 %v37_v6 }
  0x7d   :  { %v19_v9 = vpop.permute.xlu1 %18 }
  0x7e   :  { %vm23_vm1 = vcmp.eq.s32.totalorder %v16_v8, %v19_v9 }
  0x7f   :  { %v25_v10 = vsel %vm23_vm1, %v11_v2, 0.0 }
  0x80   :  { %v28_v11 = vsel %vm27_vm0, %v25_v10, 0.0 }
  0x81   :  { %v22_v12 = vpop.permute.xlu1 %21  ;;  %29 = vadd.xlane.f32.xlu0 %v28_v11 }
  0x82   :  { %vm24_vm2 = vcmp.eq.s32.totalorder %v16_v8, %v22_v12 }
  0x83   :  { %v26_v13 = vsel %vm24_vm2, %v12_v4, 0.0 }
  0x84   :  { %v31_v14 = vsel %vm27_vm0, %v26_v13, 0.0 }
  0x85   :  { %32 = vadd.xlane.f32.xlu1 %v31_v14 }
  0x8d   :  { %v36_v15 = vpop.xlane.xlu0 %35 }
  0x8e   :  { %v40_v16 = vsub.f32 %v11_v2, %v36_v15 }
  0x90   :  { %v42_v17 = vmul.f32 1.442695, %v40_v16 }
  0x91   :  { %v39_v18 = vpop.xlane.xlu0 %38 }
  0x92   :  { %86 = vpow2.f32 %v42_v17  ;;  %v41_v19 = vsub.f32 %v12_v4, %v39_v18 }
  0x94   :  { %v44_v20 = vmul.f32 1.442695, %v41_v19 }
  0x96   :  { %88 = vpow2.f32 %v44_v20 }
  0x9f   :  { %v87_v21 = vpop.eup %86 }
  0xa0   :  { %v46_v22 = vsel %vm27_vm0, %v87_v21, 0.0 }
  0xa1   :  { %47 = vadd.xlane.f32.xlu0 %v46_v22 }
  0xa3   :  { %v89_v23 = vpop.eup %88 }
  0xa4   :  { %v49_v24 = vsel %vm27_vm0, %v89_v23, 0.0 }
  0xa5   :  { %50 = vadd.xlane.f32.xlu0 %v49_v24 }
 0x10a   :  { %v30_v25 = vpop.xlane.xlu0 %29 }
 0x10b   :  { %v52_v26 = vsub.f32 %v30_v25, %v36_v15 }
 0x10d   :  { %v54_v28 = vmul.f32 1.442695, %v52_v26 }
 0x10e   :  { %v33_v27 = vpop.xlane.xlu1 %32 }
 0x10f   :  { %v53_v29 = vsub.f32 %v33_v27, %v39_v18  ;;  %90 = vpow2.f32 %v54_v28 }
 0x111   :  { %v56_v30 = vmul.f32 1.442695, %v53_v29 }
 0x11c   :  { %v91_v33 = vpop.eup %90 }
 0x12a   :  { %v48_v31 = vpop.xlane.xlu0 %47 }
 0x12b   :  { %92 = vrcp.f32 %v48_v31 }
 0x12c   :  { %94 = vpow2.f32 %v56_v30 }
 0x12e   :  { %v51_v32 = vpop.xlane.xlu0 %50 }
 0x12f   :  { %96 = vrcp.f32 %v51_v32 }
 0x138   :  { %v93_v34 = vpop.eup %92 }
 0x139   :  { %v59_v35 = vmul.f32 %v93_v34, %v91_v33  ;;  %v95_v36 = vpop.eup %94 }
 0x13b   :  { %v62_v37 = vadd.f32 1e-06, %v59_v35 }
 0x13c   :  { %v97_v38 = vpop.eup %96 }
 0x13d   :  { %98 = vlog2.f32 %v62_v37  ;;  %v61_v39 = vmul.f32 %v97_v38, %v95_v36  ;;  %v64_v41 = vsub.f32 1.0, %v62_v37 }
 0x13f   :  { %v63_v40 = vadd.f32 1e-06, %v61_v39  ;;  %v66_v42 = vmul.f32 %v64_v41, %v64_v41 }
 0x141   :  { %100 = vlog2.f32 %v63_v40  ;;  %v65_v43 = vsub.f32 1.0, %v63_v40  ;;  %v68_v45 = vmul.f32 -0.5, %v66_v42 }
 0x143   :  { %v67_v47 = vmul.f32 %v65_v43, %v65_v43 }
 0x145   :  { %v69_v50 = vmul.f32 -0.5, %v67_v47 }
 0x14a   :  { %v99_v44 = vpop.eup %98 }
 0x14b   :  { %v71_v46 = vmul.f32 0.6931472, %v99_v44 }
 0x14d   :  { %v74_v48 = vmul.f32 %v71_v46, %v68_v45 }
 0x14e   :  { %v101_v49 = vpop.eup %100 }
 0x14f   :  { %77 = vst.msk [vmem:[%s144_s2] sm:$0xff] %vm76_vm3, %v74_v48  ;;  %v73_v51 = vmul.f32 0.6931472, %v101_v49 }
 0x151   :  { %v75_v52 = vmul.f32 %v73_v51, %v69_v50 }
 0x153   :  { %78 = vst.msk [vmem:[%s144_s2 + $0x8] sm:$0xff] %vm76_vm3, %v75_v52 }

</bundles_post_ra>
